<compile_context>
chip_gen: v5e
topology: v5e:2x2
jax: 0.10.0
libtpu: 0.0.40
codegen_flags: <defaults>
</compile_context>

<pallas_src>
import jax
import jax.numpy as jnp
from jax.experimental import pallas as pl
from jax.experimental.pallas import tpu as pltpu

LANE = 128  # lanes per vreg row; batch is packed 128-per-row


def _round_up(n, m):
    return (n + m - 1) // m * m


def _cdiv(a, b):
    return (a + b - 1) // b


def _make_kernel(fns, input_dim, num_feats):
    """Kernel closure with the feature functions fused in (elementwise only)."""
    F = num_feats

    def kernel(x_ref, w1_ref, wout_ref, out_ref):
        # x_ref   : (input_dim, TILE_ROWS, 128) f32 — batch lane/sublane-packed
        # w1_ref  : (F, F) f32 in SMEM  — PyTorch lin1.weight, (out, in) layout
        # wout_ref: (1, F) f32 in SMEM  — PyTorch output.weight
        # out_ref : (TILE_ROWS, 128) f32 — batch lane/sublane-packed
        cols = [x_ref[i] for i in range(input_dim)]     # each (TILE_ROWS, 128)
        feats = [fns[k](*cols) for k in range(F)]       # each (TILE_ROWS, 128)

        acc = None
        for j in range(F):
            # hidden_j = sum_k feat_k * W1[j, k]   (SMEM scalar * vector, VPU)
            h = None
            for k in range(F):
                t = feats[k] * w1_ref[j, k]
                h = t if h is None else h + t
            c = (h * h) * wout_ref[0, j]                # square + scalar weight
            acc = c if acc is None else acc + c
        out_ref[...] = acc                               # lane-dense store

    return kernel


def smallnet_forward(x, fns, w1, wout, tile_rows=512):
    """x: (B, input_dim); w1: (F, F) lin1.weight; wout: (1, F) output.weight.

    Returns (B, 1) float32, matching SmallNet.forward.
    """
    B, input_dim = x.shape
    F = len(fns)
    x = x.astype(jnp.float32)
    w1 = jnp.asarray(w1, jnp.float32).reshape(F, F)
    wout = jnp.asarray(wout, jnp.float32).reshape(1, F)

    # Batch rows packed 128-per-lane-row; tile_rows rows of 128 per grid step.
    n_rows_raw = _cdiv(B, LANE)
    tile_rows = max(8, min(int(tile_rows), _round_up(n_rows_raw, 8)))
    tile_rows = _round_up(tile_rows, 8)              # (8,128) tiling constraint
    n_rows = _round_up(n_rows_raw, tile_rows)        # even grid
    b_pad = n_rows * LANE

    # Lane-dense relayout of x: batch fills (sublane, lane). This single
    # transpose+pad pass replaces the ~512 B/row padded-minor-dim DMA a
    # (B, 4) array would otherwise incur inside the kernel.
    # TODO(synk): have the producer emit x already in (input_dim, n_rows, 128)
    # layout so this XLA relayout pass disappears entirely.
    xt = jnp.zeros((input_dim, b_pad), jnp.float32).at[:, :B].set(x.T)
    xt = xt.reshape(input_dim, n_rows, LANE)

    kernel = _make_kernel(tuple(fns), input_dim, F)

    out = pl.pallas_call(
        kernel,
        out_shape=jax.ShapeDtypeStruct((n_rows, LANE), jnp.float32),
        grid=(n_rows // tile_rows,),
        in_specs=[
            # x tile: lane-dense, pipelined over the batch-row axis.
            pl.BlockSpec((input_dim, tile_rows, LANE), lambda i: (0, i, 0)),
            # Tiny weights as SMEM scalars (no VMEM vector operands).
            pl.BlockSpec(memory_space=pltpu.MemorySpace.SMEM),
            pl.BlockSpec(memory_space=pltpu.MemorySpace.SMEM),
        ],
        out_specs=pl.BlockSpec((tile_rows, LANE), lambda i: (i, 0)),
        compiler_params=pltpu.CompilerParams(
            dimension_semantics=("parallel",)),      # megacore / v7x 2-TC shard
    )(xt, w1, wout)

    return out.reshape(b_pad, 1)[:B]                 # (B, 1)


def smallnet_reference(x, fns, w1, wout):
    cols = [x[:, i:i + 1] for i in range(x.shape[1])]
    feats = jnp.concatenate([f(*cols) for f in fns], axis=1)
    y = feats @ w1.T
    y = y * y
    return y @ wout.T


if __name__ == "__main__":
    B = 8
    INPUT_DIM = 4

    # Feature functions (same role as `fns` in SmallNet.__init__). Fused into
    # the kernel, so they must be jnp/Mosaic-lowerable and purely elementwise.
    # TODO(synk): feature fns with ops Mosaic cannot lower (or cross-row
    # behavior) would need to run in the XLA glue instead of in the kernel.
    fns = (
        lambda a, b, c, d: a,
        lambda a, b, c, d: b * c,
        lambda a, b, c, d: jnp.tanh(d),
        lambda a, b, c, d: a + d,
    )
    F = len(fns)

    key = jax.random.PRNGKey(0)
    kx, k1, k2 = jax.random.split(key, 3)
    x = jax.random.normal(kx, (B, INPUT_DIM), dtype=jnp.float32)

    # Deterministic parameter init (PyTorch Linear layout: (out, in), no bias).
    w1 = jax.random.normal(k1, (F, F), dtype=jnp.float32) * 0.5       # lin1.weight
    wout = jax.random.normal(k2, (1, F), dtype=jnp.float32) * 0.5     # output.weight

    # Small-batch check (single grid step).
    fwd = jax.jit(lambda xi: smallnet_forward(xi, fns, w1, wout))
    out = jax.block_until_ready(fwd(x))
    ref = smallnet_reference(x, fns, w1, wout)
    assert out.shape == (B, 1)
    assert jnp.allclose(out, ref, atol=1e-4, rtol=1e-4), (out, ref)

    # Larger, non-128-aligned batch to exercise multiple grid steps + padding.
    B2 = 3000
    x2 = jax.random.normal(jax.random.PRNGKey(1), (B2, INPUT_DIM), dtype=jnp.float32)
    fwd2 = jax.jit(lambda xi: smallnet_forward(xi, fns, w1, wout, tile_rows=8))
    out2 = jax.block_until_ready(fwd2(x2))
    ref2 = smallnet_reference(x2, fns, w1, wout)
    assert out2.shape == (B2, 1)
    assert jnp.allclose(out2, ref2, atol=1e-4, rtol=1e-4)

    print("KERNEL_OK")
</pallas_src>

<mosaic_0001>
module attributes {stable_mosaic.version = 11 : i64} {
  func.func @kernel(%arg0: i32, %arg1: memref<4x8x128xf32, #tpu.memory_space<vmem>>, %arg2: memref<4x4xf32, #tpu.memory_space<smem>>, %arg3: memref<1x4xf32, #tpu.memory_space<smem>>, %arg4: memref<8x128xf32, #tpu.memory_space<vmem>>) attributes {dimension_semantics = [#tpu.dimension_semantics<parallel>], iteration_bounds = array<i64: 1>, scalar_prefetch = 0 : i64, scratch_operands = 0 : i64, tpu.core_type = #tpu.core_type<tc>, window_params = [{transform_indices = @transform_0, window_bounds = array<i64: 4, 8, 128>}, {transform_indices = @transform_1, window_bounds = array<i64: 4, 4>}, {transform_indices = @transform_2, window_bounds = array<i64: 1, 4>}, {transform_indices = @transform_3, window_bounds = array<i64: 8, 128>}]} {
    %c0 = arith.constant 0 : index
    %c0_0 = arith.constant 0 : index
    %c0_1 = arith.constant 0 : index
    %0 = vector.load %arg1[%c0, %c0_0, %c0_1] : memref<4x8x128xf32, #tpu.memory_space<vmem>>, vector<1x8x128xf32>
    %1 = vector.shape_cast %0 : vector<1x8x128xf32> to vector<8x128xf32>
    %c1 = arith.constant 1 : index
    %c0_2 = arith.constant 0 : index
    %c0_3 = arith.constant 0 : index
    %2 = vector.load %arg1[%c1, %c0_2, %c0_3] : memref<4x8x128xf32, #tpu.memory_space<vmem>>, vector<1x8x128xf32>
    %3 = vector.shape_cast %2 : vector<1x8x128xf32> to vector<8x128xf32>
    %c2 = arith.constant 2 : index
    %c0_4 = arith.constant 0 : index
    %c0_5 = arith.constant 0 : index
    %4 = vector.load %arg1[%c2, %c0_4, %c0_5] : memref<4x8x128xf32, #tpu.memory_space<vmem>>, vector<1x8x128xf32>
    %5 = vector.shape_cast %4 : vector<1x8x128xf32> to vector<8x128xf32>
    %c3 = arith.constant 3 : index
    %c0_6 = arith.constant 0 : index
    %c0_7 = arith.constant 0 : index
    %6 = vector.load %arg1[%c3, %c0_6, %c0_7] : memref<4x8x128xf32, #tpu.memory_space<vmem>>, vector<1x8x128xf32>
    %7 = vector.shape_cast %6 : vector<1x8x128xf32> to vector<8x128xf32>
    %8 = arith.mulf %3, %5 : vector<8x128xf32>
    %9 = math.tanh %7 : vector<8x128xf32>
    %10 = arith.addf %1, %7 : vector<8x128xf32>
    %c0_8 = arith.constant 0 : index
    %c0_9 = arith.constant 0 : index
    %11 = memref.load %arg2[%c0_8, %c0_9] : memref<4x4xf32, #tpu.memory_space<smem>>
    %12 = vector.broadcast %11 : f32 to vector<8x128xf32>
    %13 = arith.mulf %1, %12 : vector<8x128xf32>
    %c0_10 = arith.constant 0 : index
    %c1_11 = arith.constant 1 : index
    %14 = memref.load %arg2[%c0_10, %c1_11] : memref<4x4xf32, #tpu.memory_space<smem>>
    %15 = vector.broadcast %14 : f32 to vector<8x128xf32>
    %16 = arith.mulf %8, %15 : vector<8x128xf32>
    %17 = arith.addf %13, %16 : vector<8x128xf32>
    %c0_12 = arith.constant 0 : index
    %c2_13 = arith.constant 2 : index
    %18 = memref.load %arg2[%c0_12, %c2_13] : memref<4x4xf32, #tpu.memory_space<smem>>
    %19 = vector.broadcast %18 : f32 to vector<8x128xf32>
    %20 = arith.mulf %9, %19 : vector<8x128xf32>
    %21 = arith.addf %17, %20 : vector<8x128xf32>
    %c0_14 = arith.constant 0 : index
    %c3_15 = arith.constant 3 : index
    %22 = memref.load %arg2[%c0_14, %c3_15] : memref<4x4xf32, #tpu.memory_space<smem>>
    %23 = vector.broadcast %22 : f32 to vector<8x128xf32>
    %24 = arith.mulf %10, %23 : vector<8x128xf32>
    %25 = arith.addf %21, %24 : vector<8x128xf32>
    %26 = arith.mulf %25, %25 : vector<8x128xf32>
    %c0_16 = arith.constant 0 : index
    %c0_17 = arith.constant 0 : index
    %27 = memref.load %arg3[%c0_16, %c0_17] : memref<1x4xf32, #tpu.memory_space<smem>>
    %28 = vector.broadcast %27 : f32 to vector<8x128xf32>
    %29 = arith.mulf %26, %28 : vector<8x128xf32>
    %c1_18 = arith.constant 1 : index
    %c0_19 = arith.constant 0 : index
    %30 = memref.load %arg2[%c1_18, %c0_19] : memref<4x4xf32, #tpu.memory_space<smem>>
    %31 = vector.broadcast %30 : f32 to vector<8x128xf32>
    %32 = arith.mulf %1, %31 : vector<8x128xf32>
    %c1_20 = arith.constant 1 : index
    %c1_21 = arith.constant 1 : index
    %33 = memref.load %arg2[%c1_20, %c1_21] : memref<4x4xf32, #tpu.memory_space<smem>>
    %34 = vector.broadcast %33 : f32 to vector<8x128xf32>
    %35 = arith.mulf %8, %34 : vector<8x128xf32>
    %36 = arith.addf %32, %35 : vector<8x128xf32>
    %c1_22 = arith.constant 1 : index
    %c2_23 = arith.constant 2 : index
    %37 = memref.load %arg2[%c1_22, %c2_23] : memref<4x4xf32, #tpu.memory_space<smem>>
    %38 = vector.broadcast %37 : f32 to vector<8x128xf32>
    %39 = arith.mulf %9, %38 : vector<8x128xf32>
    %40 = arith.addf %36, %39 : vector<8x128xf32>
    %c1_24 = arith.constant 1 : index
    %c3_25 = arith.constant 3 : index
    %41 = memref.load %arg2[%c1_24, %c3_25] : memref<4x4xf32, #tpu.memory_space<smem>>
    %42 = vector.broadcast %41 : f32 to vector<8x128xf32>
    %43 = arith.mulf %10, %42 : vector<8x128xf32>
    %44 = arith.addf %40, %43 : vector<8x128xf32>
    %45 = arith.mulf %44, %44 : vector<8x128xf32>
    %c0_26 = arith.constant 0 : index
    %c1_27 = arith.constant 1 : index
    %46 = memref.load %arg3[%c0_26, %c1_27] : memref<1x4xf32, #tpu.memory_space<smem>>
    %47 = vector.broadcast %46 : f32 to vector<8x128xf32>
    %48 = arith.mulf %45, %47 : vector<8x128xf32>
    %49 = arith.addf %29, %48 : vector<8x128xf32>
    %c2_28 = arith.constant 2 : index
    %c0_29 = arith.constant 0 : index
    %50 = memref.load %arg2[%c2_28, %c0_29] : memref<4x4xf32, #tpu.memory_space<smem>>
    %51 = vector.broadcast %50 : f32 to vector<8x128xf32>
    %52 = arith.mulf %1, %51 : vector<8x128xf32>
    %c2_30 = arith.constant 2 : index
    %c1_31 = arith.constant 1 : index
    %53 = memref.load %arg2[%c2_30, %c1_31] : memref<4x4xf32, #tpu.memory_space<smem>>
    %54 = vector.broadcast %53 : f32 to vector<8x128xf32>
    %55 = arith.mulf %8, %54 : vector<8x128xf32>
    %56 = arith.addf %52, %55 : vector<8x128xf32>
    %c2_32 = arith.constant 2 : index
    %c2_33 = arith.constant 2 : index
    %57 = memref.load %arg2[%c2_32, %c2_33] : memref<4x4xf32, #tpu.memory_space<smem>>
    %58 = vector.broadcast %57 : f32 to vector<8x128xf32>
    %59 = arith.mulf %9, %58 : vector<8x128xf32>
    %60 = arith.addf %56, %59 : vector<8x128xf32>
    %c2_34 = arith.constant 2 : index
    %c3_35 = arith.constant 3 : index
    %61 = memref.load %arg2[%c2_34, %c3_35] : memref<4x4xf32, #tpu.memory_space<smem>>
    %62 = vector.broadcast %61 : f32 to vector<8x128xf32>
    %63 = arith.mulf %10, %62 : vector<8x128xf32>
    %64 = arith.addf %60, %63 : vector<8x128xf32>
    %65 = arith.mulf %64, %64 : vector<8x128xf32>
    %c0_36 = arith.constant 0 : index
    %c2_37 = arith.constant 2 : index
    %66 = memref.load %arg3[%c0_36, %c2_37] : memref<1x4xf32, #tpu.memory_space<smem>>
    %67 = vector.broadcast %66 : f32 to vector<8x128xf32>
    %68 = arith.mulf %65, %67 : vector<8x128xf32>
    %69 = arith.addf %49, %68 : vector<8x128xf32>
    %c3_38 = arith.constant 3 : index
    %c0_39 = arith.constant 0 : index
    %70 = memref.load %arg2[%c3_38, %c0_39] : memref<4x4xf32, #tpu.memory_space<smem>>
    %71 = vector.broadcast %70 : f32 to vector<8x128xf32>
    %72 = arith.mulf %1, %71 : vector<8x128xf32>
    %c3_40 = arith.constant 3 : index
    %c1_41 = arith.constant 1 : index
    %73 = memref.load %arg2[%c3_40, %c1_41] : memref<4x4xf32, #tpu.memory_space<smem>>
    %74 = vector.broadcast %73 : f32 to vector<8x128xf32>
    %75 = arith.mulf %8, %74 : vector<8x128xf32>
    %76 = arith.addf %72, %75 : vector<8x128xf32>
    %c3_42 = arith.constant 3 : index
    %c2_43 = arith.constant 2 : index
    %77 = memref.load %arg2[%c3_42, %c2_43] : memref<4x4xf32, #tpu.memory_space<smem>>
    %78 = vector.broadcast %77 : f32 to vector<8x128xf32>
    %79 = arith.mulf %9, %78 : vector<8x128xf32>
    %80 = arith.addf %76, %79 : vector<8x128xf32>
    %c3_44 = arith.constant 3 : index
    %c3_45 = arith.constant 3 : index
    %81 = memref.load %arg2[%c3_44, %c3_45] : memref<4x4xf32, #tpu.memory_space<smem>>
    %82 = vector.broadcast %81 : f32 to vector<8x128xf32>
    %83 = arith.mulf %10, %82 : vector<8x128xf32>
    %84 = arith.addf %80, %83 : vector<8x128xf32>
    %85 = arith.mulf %84, %84 : vector<8x128xf32>
    %c0_46 = arith.constant 0 : index
    %c3_47 = arith.constant 3 : index
    %86 = memref.load %arg3[%c0_46, %c3_47] : memref<1x4xf32, #tpu.memory_space<smem>>
    %87 = vector.broadcast %86 : f32 to vector<8x128xf32>
    %88 = arith.mulf %85, %87 : vector<8x128xf32>
    %89 = arith.addf %69, %88 : vector<8x128xf32>
    %c0_48 = arith.constant 0 : index
    %c0_49 = arith.constant 0 : index
    %90 = vector.load %arg4[%c0_48, %c0_49] : memref<8x128xf32, #tpu.memory_space<vmem>>, vector<8x128xf32>
    tpu.vector_store %arg4[%c0_48, %c0_49], %89 {strides = array<i32>} : memref<8x128xf32, #tpu.memory_space<vmem>>, vector<8x128xf32>,
    return
  }
  func.func @transform_0(%arg0: i32) -> (i32, i32, i32) {
    %c0_i32 = arith.constant 0 : i32
    %c0_i32_0 = arith.constant 0 : i32
    %c0_i32_1 = arith.constant 0 : i32
    return %c0_i32, %arg0, %c0_i32_0 : i32, i32, i32
  }
  func.func @transform_1(%arg0: i32) -> (i32, i32) {
    %c0_i32 = arith.constant 0 : i32
    %c0_i32_0 = arith.constant 0 : i32
    %c0_i32_1 = arith.constant 0 : i32
    return %c0_i32, %c0_i32_0 : i32, i32
  }
  func.func @transform_2(%arg0: i32) -> (i32, i32) {
    %c0_i32 = arith.constant 0 : i32
    %c0_i32_0 = arith.constant 0 : i32
    %c0_i32_1 = arith.constant 0 : i32
    return %c0_i32, %c0_i32_0 : i32, i32
  }
  func.func @transform_3(%arg0: i32) -> (i32, i32) {
    %c0_i32 = arith.constant 0 : i32
    %c0_i32_0 = arith.constant 0 : i32
    return %arg0, %c0_i32 : i32, i32
  }
}

</mosaic_0001>

<bundles_post_ra>
// kernel: _lambda_.1
= control target key start
LH: loop header
LB: loop body
LE: loop exit
PB: predicated region body
PF: predicated region fallthrough
CT: control target
= control target key end

     0   :  { %8 = vsyncpa [#allocation3], 0  ;;  %s240_s0 = inlined_call_operand.vmem [shape: f32[4,8,128], index: 0, kind: input, shape index: {}]   ;;  %s241_s1 = inlined_call_operand.vmem [shape: f32[4,4], index: 1, kind: input, shape index: {}]   ;;  %s242_s2 = inlined_call_operand.vmem [shape: f32[1,4], index: 2, kind: input, shape index: {}]   ;;  %s243_s3 = inlined_call_operand.vmem [shape: f32[8,128], index: 3, kind: output, shape index: {}]  }
   0x1   :  { %s17_s14 = sshll.u32 %s241_s1, 4  ;;  %s18_s14 = int_to_ptr.vmem [resolvable:$true] %s17_s14 }
   0x2   :  { %9 = vsyncpa [#allocation5], 0  ;;  %s26_s17 = sshll.u32 %s242_s2, 4  ;;  %s188_s18 = smov [#allocation2]   ;;  %s27_s17 = int_to_ptr.vmem [resolvable:$true] %s26_s17 }
   0x3   :  { %20 = dma.vmem_to_smem %s18_s14, 64, %s188_s18, [#allocation3]  }
   0x4   :  { %s189_s19 = smov [#allocation4]  }
   0x5   :  { %29 = dma.vmem_to_smem %s27_s17, 16, %s189_s19, [#allocation5]  }
   0x6   :  { %184 = dma.done.wait [#allocation3], 64  }
   0x7   :  { %185 = vsyncadd [#allocation3], 4294967232 }
   0x8   :  { %186 = dma.done.wait [#allocation5], 16  }
   0x9   :  { %187 = vsyncadd [#allocation5], 4294967280 }
   0xa   :  { %38 = sfence }
   0xb   :  { %s49_s20 = sld [smem:[#allocation2]]  ;;  %v135_v0 = vld [vmem:[%s240_s0 + $0x8] sm:$0xff]  ;;  %v136_v1 = vld [vmem:[%s240_s0 + $0x10] sm:$0xff]  ;;  %v137_v2 = vld [vmem:[%s240_s0 + $0x18] sm:$0xff] }
   0xc   :  { %s138_s25 = sld [smem:[#allocation2 + $0x1]]  ;;  %158 = vtanh.f32 %v137_v2  ;;  %v39_v3 = vld [vmem:[%s240_s0] sm:$0xff]  ;;  %v46_v4 = vmul.f32 %v136_v1, %v135_v0 }
   0xd   :  { %s139_s26 = sld [smem:[#allocation2 + $0x2]]  ;;  %v48_v6 = vadd.f32 %v137_v2, %v39_v3 }
   0xe   :  { %s140_s27 = sld [smem:[#allocation2 + $0x3]] }
   0xf   :  { %s228_s30 = sld [smem:[#allocation4]] }
  0x10   :  { %s141_s4 = sld [smem:[#allocation2 + $0x80]] }
  0x11   :  { %v50_v5 = vstv %s49_s20  ;;  %s142_s5 = sld [smem:[#allocation2 + $0x81]] }
  0x12   :  { %v51_v7 = vmul.f32 %v50_v5, %v39_v3  ;;  %v53_v8 = vstv %s138_s25  ;;  %s143_s6 = sld [smem:[#allocation2 + $0x82]]  ;;  %v159_v9 = vpop.eup %158 }
  0x13   :  { %v54_v10 = vmul.f32 %v53_v8, %v46_v4  ;;  %v57_v11 = vstv %s139_s26  ;;  %s144_s7 = sld [smem:[#allocation2 + $0x83]] }
  0x14   :  { %v58_v12 = vmul.f32 %v159_v9, %v57_v11  ;;  %v61_v13 = vstv %s140_s27  ;;  %s230_s8 = sld [smem:[#allocation4 + $0x1]] }
  0x15   :  { %v55_v14 = vadd.f32 %v54_v10, %v51_v7  ;;  %s146_s0 = sld [smem:[#allocation2 + $0x100]]  ;;  %v62_v15 = vmul.f32 %v61_v13, %v48_v6  ;;  %v66_v37 = vstv %s228_s30 }
  0x16   :  { %v69_v16 = vstv %s141_s4  ;;  %s147_s9 = sld [smem:[#allocation2 + $0x101]] }
  0x17   :  { %v59_v17 = vadd.f32 %v58_v12, %v55_v14  ;;  %v70_v18 = vmul.f32 %v69_v16, %v39_v3  ;;  %v72_v19 = vstv %s142_s5  ;;  %s148_s10 = sld [smem:[#allocation2 + $0x102]] }
  0x18   :  { %v73_v20 = vmul.f32 %v72_v19, %v46_v4  ;;  %v76_v21 = vstv %s143_s6  ;;  %s149_s11 = sld [smem:[#allocation2 + $0x103]] }
  0x19   :  { %v77_v22 = vmul.f32 %v159_v9, %v76_v21  ;;  %v80_v23 = vstv %s144_s7  ;;  %s232_s12 = sld [smem:[#allocation4 + $0x2]]  ;;  %v63_v24 = vadd.f32 %v62_v15, %v59_v17 }
  0x1a   :  { %v74_v25 = vadd.f32 %v73_v20, %v70_v18  ;;  %v81_v26 = vmul.f32 %v80_v23, %v48_v6  ;;  %s151_s13 = sld [smem:[#allocation2 + $0x180]]  ;;  %v85_v38 = vstv %s230_s8 }
  0x1b   :  { %v89_v27 = vstv %s146_s0  ;;  %s152_s14 = sld [smem:[#allocation2 + $0x181]]  ;;  %v64_v33 = vmul.f32 %v63_v24, %v63_v24 }
  0x1c   :  { %v78_v28 = vadd.f32 %v77_v22, %v74_v25  ;;  %v90_v29 = vmul.f32 %v89_v27, %v39_v3  ;;  %v92_v30 = vstv %s147_s9  ;;  %s153_s15 = sld [smem:[#allocation2 + $0x182]] }
  0x1d   :  { %v93_v31 = vmul.f32 %v92_v30, %v46_v4  ;;  %v96_v32 = vstv %s148_s10  ;;  %s154_s16 = sld [smem:[#allocation2 + $0x183]]  ;;  %v67_v46 = vmul.f32 %v66_v37, %v64_v33 }
  0x1e   :  { %v82_v34 = vadd.f32 %v81_v26, %v78_v28  ;;  %v97_v35 = vmul.f32 %v159_v9, %v96_v32  ;;  %v100_v36 = vstv %s149_s11  ;;  %s155_s17 = sld [smem:[#allocation4 + $0x3]] }
  0x1f   :  { %v94_v39 = vadd.f32 %v93_v31, %v90_v29  ;;  %v101_v40 = vmul.f32 %v100_v36, %v48_v6  ;;  %v105_v53 = vstv %s232_s12 }
  0x20   :  { %v83_v41 = vmul.f32 %v82_v34, %v82_v34  ;;  %v109_v42 = vstv %s151_s13 }
  0x21   :  { %v98_v43 = vadd.f32 %v97_v35, %v94_v39  ;;  %v110_v44 = vmul.f32 %v109_v42, %v39_v3  ;;  %v112_v45 = vstv %s152_s14 }
  0x22   :  { %v86_v47 = vmul.f32 %v85_v38, %v83_v41  ;;  %v113_v48 = vmul.f32 %v112_v45, %v46_v4  ;;  %v116_v49 = vstv %s153_s15 }
  0x23   :  { %v102_v50 = vadd.f32 %v101_v40, %v98_v43  ;;  %v117_v51 = vmul.f32 %v159_v9, %v116_v49  ;;  %v120_v52 = vstv %s154_s16 }
  0x24   :  { %v114_v54 = vadd.f32 %v113_v48, %v110_v44  ;;  %v121_v55 = vmul.f32 %v120_v52, %v48_v6  ;;  %v87_v57 = vadd.f32 %v86_v47, %v67_v46  ;;  %v125_v61 = vstv %s155_s17 }
  0x25   :  { %v103_v56 = vmul.f32 %v102_v50, %v102_v50 }
  0x26   :  { %v118_v58 = vadd.f32 %v117_v51, %v114_v54 }
  0x27   :  { %v106_v59 = vmul.f32 %v105_v53, %v103_v56 }
  0x28   :  { %v122_v60 = vadd.f32 %v121_v55, %v118_v58 }
  0x29   :  { %v107_v62 = vadd.f32 %v106_v59, %v87_v57 }
  0x2a   :  { %v123_v63 = vmul.f32 %v122_v60, %v122_v60 }
  0x2c   :  { %v126_v0 = vmul.f32 %v125_v61, %v123_v63 }
  0x2e   :  { %v127_v1 = vadd.f32 %v126_v0, %v107_v62 }
  0x30   :  { %128 = vst [vmem:[%s243_s3] sm:$0xff] %v127_v1 }
  0x31   :  { %133 = vsyncpa [#allocation3], 1 }
  0x32   :  { %134 = vsyncpa [#allocation5], 1 }

</bundles_post_ra>
